<compile_context>
chip_gen: v6e
topology: v6e:2x2x1
jax: 0.10.0
libtpu: 0.0.40
codegen_flags: <defaults>
</compile_context>

<pallas_src>
import jax
import jax.numpy as jnp
from jax import lax
from jax.experimental import pallas as pl
from jax.experimental.pallas import tpu as pltpu

_SUBLANE = 8                     # f32 sublanes per vreg
_LANE = 128                      # lanes per vreg
_TARGET_BLOCK_BYTES = 2 << 20    # ~2 MiB x/out blocks: plenty of grid steps,
                                 # safe for all scoped-VMEM defaults

_COMPILER_PARAMS = pltpu.CompilerParams(
    dimension_semantics=("parallel", "arbitrary"),
    vmem_limit_bytes=32 * 1024 * 1024,   # <= physical VMEM on every generation
)


# ---------------------------------------------------------------------------
# Kernels
# ---------------------------------------------------------------------------
def _film_kernel(cond_ref, w_ref, x_ref, o_ref, proj_ref):
    """Standard path (c >= 8): one batch tile x one spatial tile.

    cond_ref: (bt, dim)      conditioning tile (re-DMA'd only when the batch
                             grid index changes)
    w_ref:    (c, dim)       nn.Linear weight in native (out, in) layout
    x_ref:    (bt, c, hw_t)  feature-map tile, spatial dims flattened on lanes
    o_ref:    (bt, c, hw_t)  output tile
    proj_ref: (bt, c) f32    scratch caching the projection for the whole batch
                             tile (computed once, at spatial step 0)
    """
    @pl.when(pl.program_id(1) == 0)
    def _():
        # (bt, dim) . (c, dim)^T -> (bt, c) on the MXU, f32 accumulation.
        proj_ref[...] = lax.dot_general(
            cond_ref[...], w_ref[...],
            dimension_numbers=(((1,), (1,)), ((), ())),
            preferred_element_type=jnp.float32)

    # Broadcast-add in the storage dtype (bf16 add is native on v6e/v7x); the
    # cast touches only the tiny (bt, c, 1) projection, never the x tile.
    o_ref[...] = x_ref[...] + proj_ref[...][:, :, None].astype(x_ref.dtype)


def _film_rows_kernel(cond_ref, w_ref, x_ref, o_ref, proj_ref):
    """Small-c path: batch folded into the sublane axis (rows = b * c).

    cond_ref: (rt, dim)   conditioning repeated per (batch, channel) row
    w_ref:    (rt, dim)   weight row matching each (batch, channel) row
    x_ref:    (rt, hw_t)  feature-map rows, spatial dims flattened on lanes
    o_ref:    (rt, hw_t)
    proj_ref: (rt, 1) f32 per-row projection, computed at spatial step 0 and
                          reused across all spatial tiles of this row tile
    """
    @pl.when(pl.program_id(1) == 0)
    def _():
        proj_ref[...] = jnp.sum(
            cond_ref[...].astype(jnp.float32) * w_ref[...].astype(jnp.float32),
            axis=-1, keepdims=True)

    o_ref[...] = x_ref[...] + proj_ref[...].astype(x_ref.dtype)


# ---------------------------------------------------------------------------
# Tile selection helpers (keep blocks ~2 MiB, layout-legal on every chip)
# ---------------------------------------------------------------------------
def _round_down(value, multiple):
    return (value // multiple) * multiple


def _pick_hw_tile(hw, bytes_per_lane, hw_tile):
    """Lane-axis tile: a multiple of 128, or the full spatial extent."""
    if hw <= _LANE:
        return hw
    if hw_tile is not None:
        hw_t = min(hw, int(hw_tile))
        if hw_t < hw:
            hw_t = max(_LANE, _round_down(hw_t, _LANE))
        return hw_t
    if hw * bytes_per_lane <= _TARGET_BLOCK_BYTES:
        return hw
    hw_t = max(_LANE, _round_down(_TARGET_BLOCK_BYTES // bytes_per_lane, _LANE))
    return min(hw_t, _round_down(hw, _LANE))


def _pick_batch_tile(b, block_rows_bytes, batch_tile):
    """Batch tile for the standard path.

    bt is the second-minor dim of the conditioning block, so it must be a
    multiple of 8 or equal to b.
    """
    if batch_tile is not None:
        bt = max(1, min(b, int(batch_tile)))
    else:
        bt = max(1, min(b, _TARGET_BLOCK_BYTES // max(1, block_rows_bytes)))
        if b >= 2:
            bt = min(bt, -(-b // 2))   # >= 2 batch grid steps for v7x megacore
    if bt < b:
        bt = _round_down(bt, _SUBLANE)
        if bt == 0:
            bt = min(b, _SUBLANE)
    return b if bt >= b else bt


def _pick_row_tile(rows, block_row_bytes, row_tile):
    """Row tile for the folded path: multiple of 8 or the full row count."""
    if row_tile is not None:
        rt = max(1, min(rows, int(row_tile)))
    else:
        rt = max(_SUBLANE,
                 min(rows, _TARGET_BLOCK_BYTES // max(1, block_row_bytes)))
        if rows >= 2 * _SUBLANE:
            rt = min(rt, -(-rows // 2))   # >= 2 row grid steps for megacore
    if rt < rows:
        rt = _round_down(rt, _SUBLANE)
        if rt == 0:
            rt = min(rows, _SUBLANE)
    return rows if rt >= rows else rt


# ---------------------------------------------------------------------------
# Wrapper
# ---------------------------------------------------------------------------
def feature_wise_linear_modulation(
    x: jnp.ndarray,
    conditioning: jnp.ndarray,
    weight: jnp.ndarray,
    *,
    affine: bool = False,
    batch_tile: int | None = None,
    hw_tile: int | None = None,
    donate_x: bool = False,
) -> jnp.ndarray:
    """Pallas equivalent of FeatureWiseLinearModulation.forward (affine=False).

    x:            (b, c, h, w)
    conditioning: (b, dim)
    weight:       (c, dim)  PyTorch nn.Linear weight layout (out, in), no bias
    Returns       (b, c, h, w) = x + (conditioning @ weight.T)[:, :, None, None]

    donate_x=True aliases x's HBM buffer to the output (only if the caller does
    not use x afterwards).
    """
    if affine:
        # TODO(synk): affine=True not supported (upstream chunk on size-1 dim).
        raise NotImplementedError("affine=True is not supported")

    b, c, h, w = x.shape
    dim = conditioning.shape[-1]
    hw = h * w
    itemsize = x.dtype.itemsize
    aliases = {2: 0} if donate_x else {}

    if c < _SUBLANE:
        # Small channel count: fold batch into the sublane axis so x/out blocks
        # are fully (8, 128)-packed (c=4 would otherwise pad to 8 sublanes).
        rows = b * c
        x_flat = x.reshape(rows, hw)
        cond_rows = jnp.repeat(conditioning, c, axis=0)   # row r -> cond[r // c]
        w_rows = jnp.tile(weight, (b, 1))                 # row r -> weight[r % c]

        hw_t = _pick_hw_tile(hw, _SUBLANE * itemsize, hw_tile)
        rt = _pick_row_tile(
            rows, hw_t * itemsize,
            None if batch_tile is None else batch_tile * c)
        grid = (pl.cdiv(rows, rt), pl.cdiv(hw, hw_t))

        out = pl.pallas_call(
            _film_rows_kernel,
            out_shape=jax.ShapeDtypeStruct((rows, hw), x.dtype),
            grid=grid,
            in_specs=[
                pl.BlockSpec((rt, dim), lambda i, j: (i, 0)),     # cond rows
                pl.BlockSpec((rt, dim), lambda i, j: (i, 0)),     # weight rows
                pl.BlockSpec((rt, hw_t), lambda i, j: (i, j)),    # x rows
            ],
            out_specs=pl.BlockSpec((rt, hw_t), lambda i, j: (i, j)),
            scratch_shapes=[pltpu.VMEM((rt, 1), jnp.float32)],
            compiler_params=_COMPILER_PARAMS,
            input_output_aliases=aliases,
        )(cond_rows, w_rows, x_flat)
        return out.reshape(b, c, h, w)

    # Standard path: blocks are (bt, c, hw_t) with the full channel extent.
    x_flat = x.reshape(b, c, hw)
    hw_t = _pick_hw_tile(hw, c * itemsize, hw_tile)
    bt = _pick_batch_tile(b, c * hw_t * itemsize, batch_tile)
    grid = (pl.cdiv(b, bt), pl.cdiv(hw, hw_t))

    out = pl.pallas_call(
        _film_kernel,
        out_shape=jax.ShapeDtypeStruct((b, c, hw), x.dtype),
        grid=grid,
        in_specs=[
            pl.BlockSpec((bt, dim), lambda i, j: (i, 0)),        # conditioning
            pl.BlockSpec((c, dim), lambda i, j: (0, 0)),         # weight
            pl.BlockSpec((bt, c, hw_t), lambda i, j: (i, 0, j)),  # x tile
        ],
        out_specs=pl.BlockSpec((bt, c, hw_t), lambda i, j: (i, 0, j)),
        scratch_shapes=[pltpu.VMEM((bt, c), jnp.float32)],
        compiler_params=_COMPILER_PARAMS,
        input_output_aliases=aliases,
    )(conditioning, weight, x_flat)
    return out.reshape(b, c, h, w)


# ---------------------------------------------------------------------------
# Reference + self-test
# ---------------------------------------------------------------------------
def _reference(x, conditioning, weight):
    proj = conditioning.astype(jnp.float32) @ weight.astype(jnp.float32).T
    return x.astype(jnp.float32) + proj[:, :, None, None]


if __name__ == "__main__":
    def _run_case(seed, b, c, h, w, dim, dtype, atol, rtol, **kwargs):
        kx, kc, kw = jax.random.split(jax.random.PRNGKey(seed), 3)
        x = jax.random.normal(kx, (b, c, h, w), dtype=jnp.float32).astype(dtype)
        cond = jax.random.normal(kc, (b, dim), dtype=jnp.float32).astype(dtype)
        wgt = (jax.random.normal(kw, (c, dim), dtype=jnp.float32)
               / jnp.sqrt(dim)).astype(dtype)

        ref = _reference(x, cond, wgt)
        out = jax.block_until_ready(
            feature_wise_linear_modulation(x, cond, wgt, **kwargs))

        assert out.shape == (b, c, h, w)
        assert out.dtype == jnp.dtype(dtype)
        assert jnp.allclose(out.astype(jnp.float32), ref, atol=atol, rtol=rtol), (
            f"mismatch in test case seed={seed}")

    # NOTE: seeded with PRNGKey(0)/(1)/(2)/(3) -> deterministic inputs.
    # 1) small-c (sublane-folded) path, single block (primary demo shape).
    _run_case(0, 2, 4, 16, 16, 32, jnp.float32, 1e-4, 1e-4)
    # 2) folded path with a spatial grid axis -> exercises the cached projection
    #    being reused across hw tiles (pl.when(j == 0) path).
    _run_case(1, 2, 4, 16, 16, 32, jnp.float32, 1e-4, 1e-4, hw_tile=128)
    # 3) standard (c >= 8) path: batch + spatial tiling, MXU projection cached
    #    per batch tile, grid = (2, 2).
    _run_case(2, 16, 64, 16, 16, 32, jnp.float32, 1e-4, 1e-4,
              batch_tile=8, hw_tile=128)
    # 4) bf16 activations: storage-dtype add, auto tile selection.
    _run_case(3, 2, 64, 16, 16, 32, jnp.bfloat16, 1e-1, 1e-1)

    print("KERNEL_OK")
</pallas_src>

<mosaic_0001>
module attributes {stable_mosaic.version = 11 : i64} {
  func.func @_film_rows_kernel(%arg0: i32, %arg1: i32, %arg2: memref<8x32xf32, #tpu.memory_space<vmem>>, %arg3: memref<8x32xf32, #tpu.memory_space<vmem>>, %arg4: memref<8x256xf32, #tpu.memory_space<vmem>>, %arg5: memref<8x256xf32, #tpu.memory_space<vmem>>, %arg6: memref<8x1xf32, #tpu.memory_space<vmem>>) attributes {dimension_semantics = [#tpu.dimension_semantics<parallel>, #tpu.dimension_semantics<arbitrary>], iteration_bounds = array<i64: 1, 1>, scalar_prefetch = 0 : i64, scratch_operands = 1 : i64, tpu.core_type = #tpu.core_type<tc>, window_params = [{transform_indices = @transform_0, window_bounds = array<i64: 8, 32>}, {transform_indices = @transform_1, window_bounds = array<i64: 8, 32>}, {transform_indices = @transform_2, window_bounds = array<i64: 8, 256>}, {transform_indices = @transform_3, window_bounds = array<i64: 8, 256>}]} {
    %c0_i32 = arith.constant 0 : i32
    %0 = arith.cmpi eq, %arg1, %c0_i32 : i32
    %1 = arith.extui %0 : i1 to i32
    %c0_i32_0 = arith.constant 0 : i32
    %2 = arith.cmpi ne, %1, %c0_i32_0 : i32
    scf.if %2 {
      %c0_6 = arith.constant 0 : index
      %c0_7 = arith.constant 0 : index
      %8 = vector.load %arg2[%c0_6, %c0_7] : memref<8x32xf32, #tpu.memory_space<vmem>>, vector<8x32xf32>
      %c0_8 = arith.constant 0 : index
      %c0_9 = arith.constant 0 : index
      %9 = vector.load %arg3[%c0_8, %c0_9] : memref<8x32xf32, #tpu.memory_space<vmem>>, vector<8x32xf32>
      %10 = arith.mulf %8, %9 : vector<8x32xf32>
      %cst = arith.constant dense<0.000000e+00> : vector<8xf32>
      %11 = vector.multi_reduction <add>, %10, %cst [1] : vector<8x32xf32> to vector<8xf32>
      %12 = vector.shape_cast %11 : vector<8xf32> to vector<8x1xf32>
      %c0_10 = arith.constant 0 : index
      %c0_11 = arith.constant 0 : index
      %13 = vector.load %arg6[%c0_10, %c0_11] : memref<8x1xf32, #tpu.memory_space<vmem>>, vector<8x1xf32>
      tpu.vector_store %arg6[%c0_10, %c0_11], %12 {strides = array<i32>} : memref<8x1xf32, #tpu.memory_space<vmem>>, vector<8x1xf32>,
    } else {
    }
    %c0 = arith.constant 0 : index
    %c0_1 = arith.constant 0 : index
    %3 = vector.load %arg4[%c0, %c0_1] : memref<8x256xf32, #tpu.memory_space<vmem>>, vector<8x256xf32>
    %c0_2 = arith.constant 0 : index
    %c0_3 = arith.constant 0 : index
    %4 = vector.load %arg6[%c0_2, %c0_3] : memref<8x1xf32, #tpu.memory_space<vmem>>, vector<8x1xf32>
    %5 = vector.broadcast %4 : vector<8x1xf32> to vector<8x256xf32>
    %6 = arith.addf %3, %5 : vector<8x256xf32>
    %c0_4 = arith.constant 0 : index
    %c0_5 = arith.constant 0 : index
    %7 = vector.load %arg5[%c0_4, %c0_5] : memref<8x256xf32, #tpu.memory_space<vmem>>, vector<8x256xf32>
    tpu.vector_store %arg5[%c0_4, %c0_5], %6 {strides = array<i32>} : memref<8x256xf32, #tpu.memory_space<vmem>>, vector<8x256xf32>,
    return
  }
  func.func @transform_0(%arg0: i32, %arg1: i32) -> (i32, i32) {
    %c0_i32 = arith.constant 0 : i32
    %c0_i32_0 = arith.constant 0 : i32
    return %arg0, %c0_i32 : i32, i32
  }
  func.func @transform_1(%arg0: i32, %arg1: i32) -> (i32, i32) {
    %c0_i32 = arith.constant 0 : i32
    %c0_i32_0 = arith.constant 0 : i32
    return %arg0, %c0_i32 : i32, i32
  }
  func.func @transform_2(%arg0: i32, %arg1: i32) -> (i32, i32) {
    %c0_i32 = arith.constant 0 : i32
    return %arg0, %arg1 : i32, i32
  }
  func.func @transform_3(%arg0: i32, %arg1: i32) -> (i32, i32) {
    %c0_i32 = arith.constant 0 : i32
    return %arg0, %arg1 : i32, i32
  }
}

</mosaic_0001>

<bundles_post_ra>
// kernel: tpu_custom_call.1
= control target key start
LH: loop header
LB: loop body
LE: loop exit
PB: predicated region body
PF: predicated region fallthrough
CT: control target
= control target key end

     0   :  { %8 = vsyncpa [#allocation4], 0  ;;  %s220_s0 = inlined_call_operand.hbm [shape: f32[8,32], index: 0, kind: input, shape index: {}]   ;;  %s221_s1 = inlined_call_operand.hbm [shape: f32[8,32], index: 1, kind: input, shape index: {}]   ;;  %s222_s2 = inlined_call_operand.hbm [shape: f32[8,256], index: 2, kind: input, shape index: {}]   ;;  %s223_s3 = inlined_call_operand.hbm [shape: f32[8,256], index: 3, kind: output, shape index: {}]  }
   0x1   :  { %9 = vsyncpa [#allocation7], 0 }
   0x2   :  { %10 = vsyncpa [#allocation5], 0  ;;  %s183_s12 = smov [#allocation6]   ;;  %s184_s14 = smov [#allocation3]  }
   0x3   :  { %s27_s13 = sshll.u32 %s183_s12, 4  ;;  %s17_s15 = sshll.u32 %s184_s14, 4  ;;  %s28_s13 = int_to_ptr.vmem [resolvable:$true] %s27_s13  ;;  %s18_s15 = int_to_ptr.vmem [resolvable:$true] %s17_s15 }
   0x4   :  { %s105_s16 = scalar_lea.vmem %s28_s13, 128  ;;  %p110_p1 = scmp.lt.s32.totalorder %s28_s13, %s28_s13 }
   0x5   :  { %p106_p0 = scmp.ne.s32.totalorder %s28_s13, %s105_s16  ;;  %p111_p2 = scmp.lt.s32.totalorder %s105_s16, %s105_s16 }
   0x7   :  { %p112_p3 = por %p111_p2, %p110_p1 }
   0x9   :  { %p113_p4 = pnand %p112_p3, %p106_p0 }
   0xb   :  { %116 = shalt.err (!%p113_p4)
}
   0xc   :  { %30 = dma.hbm_to_vmem [thread:$0]  %s221_s1, 128, %s28_s13, [#allocation7]  }
   0xd   :  { %s125_s19 = scalar_lea.vmem %s18_s15, 128  ;;  %p130_p6 = scmp.lt.s32.totalorder %s18_s15, %s18_s15 }
   0xe   :  { %p126_p5 = scmp.ne.s32.totalorder %s18_s15, %s125_s19  ;;  %p131_p7 = scmp.lt.s32.totalorder %s125_s19, %s125_s19 }
  0x10   :  { %p132_p8 = por %p131_p7, %p130_p6 }
  0x12   :  { %p133_p9 = pnand %p132_p8, %p126_p5 }
  0x14   :  { %136 = shalt.err (!%p133_p9)
}
  0x15   :  { %20 = dma.hbm_to_vmem [thread:$0]  %s220_s0, 128, %s18_s15, [#allocation4]  }
  0x16   :  { %s185_s22 = smov [#allocation8]  }
  0x17   :  { %s37_s23 = sshll.u32 %s185_s22, 4  ;;  %s38_s23 = int_to_ptr.vmem [resolvable:$true] %s37_s23 }
  0x18   :  { %s145_s24 = scalar_lea.vmem %s38_s23, 256  ;;  %p150_p11 = scmp.lt.s32.totalorder %s38_s23, %s38_s23 }
  0x19   :  { %p146_p10 = scmp.ne.s32.totalorder %s38_s23, %s145_s24  ;;  %p151_p12 = scmp.lt.s32.totalorder %s145_s24, %s145_s24 }
  0x1b   :  { %p152_p13 = por %p151_p12, %p150_p11 }
  0x1d   :  { %p153_p0 = pnand %p152_p13, %p146_p10 }
  0x1f   :  { %156 = shalt.err (!%p153_p0)
}
  0x20   :  { %40 = dma.hbm_to_vmem [thread:$0]  %s222_s2, 256, %s38_s23, [#allocation7]  }
  0x21   :  { %177 = dma.done.wait [#allocation4], 128  }
  0x22   :  { %178 = vsyncadd [#allocation4], 4294967168 }
  0x23   :  { %179 = dma.done.wait [#allocation7], 384  }
  0x24   :  { %180 = vsyncadd [#allocation7], 4294966912  ;;  %v54_v0 = vld [vmem:[#allocation3] sm:$0xff]  ;;  %v55_v1 = vld [vmem:[#allocation6] sm:$0xff]  ;;  %vm57_vm0 = vcmask 261120   ;;  %v186_v4 = vmov 0  }
  0x25   :  { %v56_v2 = vmul.f32 %v55_v1, %v54_v0  ;;  %96 = vset.pattern.permute.xlu0 %v186_v4  ;;  %vm61_vm1 = vcmask 7168   ;;  %v63_v7 = vld [vmem:[#allocation8] sm:$0xff]  ;;  %v64_v8 = vld [vmem:[#allocation8 + $0x8] sm:$0xff]  ;;  %s187_s0 = smov [#allocation9]  }
  0x26   :  { %s81_s2 = sshll.u32 %s187_s0, 4  ;;  %s82_s2 = int_to_ptr.vmem [resolvable:$true] %s81_s2 }
  0x27   :  { %v58_v3 = vsel %vm57_vm0, %v56_v2, 0.0  ;;  %s157_s26 = scalar_lea.vmem %s82_s2, 256  ;;  %p162_p2 = scmp.lt.s32.totalorder %s82_s2, %s82_s2 }
  0x28   :  { %59 = vadd.xlane.f32.xlu0 %v58_v3  ;;  %p158_p1 = scmp.ne.s32.totalorder %s82_s2, %s157_s26  ;;  %p163_p3 = scmp.lt.s32.totalorder %s157_s26, %s157_s26 }
  0x2a   :  { %p164_p4 = por %p163_p3, %p162_p2 }
  0x2c   :  { %p165_p5 = pnand %p164_p4, %p158_p1 }
  0xb1   :  { %v60_v5 = vpop.xlane.xlu0 %59 }
  0xb2   :  { %62 = vst.msk [vmem:[#allocation2] sm:$0xff] %vm61_vm1, %v60_v5 }
  0xb9   :  { %v65_v6 = vld [vmem:[#allocation2] sm:$0xff] }
  0xba   :  { %68 = vperm.xlu0 %96, %v65_v6  }
 0x135   :  { %v69_v9 = vpop.permute.xlu0 %68 }
 0x136   :  { %v71_v10 = vadd.f32 %v69_v9, %v63_v7  ;;  %v72_v11 = vadd.f32 %v69_v9, %v64_v8 }
 0x138   :  { %73 = vst [vmem:[#allocation9] sm:$0xff] %v71_v10  ;;  %74 = vst [vmem:[#allocation9 + $0x8] sm:$0xff] %v72_v11 }
 0x139   :  { %168 = shalt.err (!%p165_p5)
}
 0x13a   :  { %84 = dma.vmem_to_hbm [thread:$0]  %s82_s2, 256, %s223_s3, [#allocation5]  }
 0x13b   :  { %181 = dma.done.wait [#allocation5], 256  }
 0x13c   :  { %182 = vsyncadd [#allocation5], 4294967040 }
 0x13d   :  { %88 = vsyncpa [#allocation4], 1 }
 0x13e   :  { %89 = vsyncpa [#allocation7], 1 }
 0x13f   :  { %90 = vsyncpa [#allocation5], 1 }

</bundles_post_ra>
